<compile_context>
chip_gen: v5e
topology: v5e:2x2
jax: 0.10.0
libtpu: 0.0.40
codegen_flags: <defaults>
</compile_context>

<pallas_src>
import functools

import jax
import jax.numpy as jnp
from jax.experimental import pallas as pl
from jax.experimental.pallas import tpu as pltpu

_LANE = 128
_SUBLANE = 8


def _round_up(n, m):
    return ((n + m - 1) // m) * m


def _mlp_kernel(x_ref, w1_ref, w2_ref, w3_ref, b_ref, o_ref):
    # layer_1: bf16 MXU matmul, f32 accumulate; bias + ReLU in f32.
    h1 = jnp.dot(x_ref[...], w1_ref[...], preferred_element_type=jnp.float32)
    h1 = jnp.maximum(h1 + b_ref[0:1, : h1.shape[1]], 0.0)
    # layer_2
    h2 = jnp.dot(h1.astype(w2_ref.dtype), w2_ref[...],
                 preferred_element_type=jnp.float32)
    h2 = jnp.maximum(h2 + b_ref[1:2, : h2.shape[1]], 0.0)
    # output_layer (no activation)
    out = jnp.dot(h2.astype(w3_ref.dtype), w3_ref[...],
                  preferred_element_type=jnp.float32)
    o_ref[...] = (out + b_ref[2:3, : out.shape[1]]).astype(o_ref.dtype)


def simple_classification_forward(x, params, batch_size, *, max_batch_tile=256):
    """Pallas-fused forward. Returns (logits[B, num_classes], batch_size)."""
    w1, b1, w2, b2, w3, b3 = params
    B, K = x.shape
    H = w1.shape[1]
    C = w3.shape[1]

    # Lane-dense padded feature dims (multiples of 128).
    K_pad = _round_up(K, _LANE)
    H_pad = _round_up(H, _LANE)
    C_pad = _round_up(C, _LANE)
    BW = max(H_pad, C_pad)          # stacked-bias row width

    # Batch tiling: one big tile per grid step; round batch to sublane multiple.
    if B <= max_batch_tile:
        TB = _round_up(B, _SUBLANE)
    else:
        TB = max_batch_tile
    B_pad = _round_up(B, TB)

    bf16 = jnp.bfloat16
    # Zero-padded, bf16 MXU operands (padded rows/cols are exact zeros, and
    # ReLU(0 + 0) = 0, so padding never leaks into the real outputs).
    x_p = jnp.zeros((B_pad, K_pad), bf16).at[:B, :K].set(x.astype(bf16))
    w1_p = jnp.zeros((K_pad, H_pad), bf16).at[:K, :H].set(w1.astype(bf16))
    w2_p = jnp.zeros((H_pad, H_pad), bf16).at[:H, :H].set(w2.astype(bf16))
    w3_p = jnp.zeros((H_pad, C_pad), bf16).at[:H, :C].set(w3.astype(bf16))
    # All three biases in one f32 buffer -> single small DMA window.
    b_p = jnp.zeros((3, BW), jnp.float32)
    b_p = b_p.at[0, :H].set(b1.reshape(-1).astype(jnp.float32))
    b_p = b_p.at[1, :H].set(b2.reshape(-1).astype(jnp.float32))
    b_p = b_p.at[2, :C].set(b3.reshape(-1).astype(jnp.float32))

    grid = (B_pad // TB,)
    const2d = lambda i: (0, 0)      # weights/biases: VMEM-resident, never re-fetched

    flops = 2 * B_pad * (K_pad * H_pad + H_pad * H_pad + H_pad * C_pad)
    bytes_accessed = (x_p.size * 2 + w1_p.size * 2 + w2_p.size * 2
                      + w3_p.size * 2 + b_p.size * 4 + B_pad * C_pad * 4)

    logits_pad = pl.pallas_call(
        _mlp_kernel,
        out_shape=jax.ShapeDtypeStruct((B_pad, C_pad), jnp.float32),
        grid=grid,
        in_specs=[
            pl.BlockSpec((TB, K_pad), lambda i: (i, 0)),   # activations: tiled on batch
            pl.BlockSpec((K_pad, H_pad), const2d),
            pl.BlockSpec((H_pad, H_pad), const2d),
            pl.BlockSpec((H_pad, C_pad), const2d),
            pl.BlockSpec((3, BW), const2d),
        ],
        out_specs=pl.BlockSpec((TB, C_pad), lambda i: (i, 0)),
        compiler_params=pltpu.CompilerParams(
            dimension_semantics=("parallel",)),            # shards batch tiles across TCs on v7x
        cost_estimate=pl.CostEstimate(
            flops=flops, transcendentals=0, bytes_accessed=bytes_accessed),
    )(x_p, w1_p, w2_p, w3_p, b_p)

    return logits_pad[:B, :C], batch_size
    # TODO(synk): if hidden_size is scaled to 4K+, add a K-tiled "arbitrary" grid
    # axis with a VMEM f32 accumulator (pl.when init/finalize) so the working set
    # fits v7x's 64 MiB VMEM.


def init_params(key, input_size, hidden_size, num_classes):
    """Deterministic PyTorch-style uniform init; W stored as [in, out], b as [1, out]."""
    ks = jax.random.split(key, 6)

    def linear(kw, kb, fan_in, fan_out):
        bound = 1.0 / jnp.sqrt(jnp.asarray(fan_in, jnp.float32))
        w = jax.random.uniform(kw, (fan_in, fan_out), jnp.float32, -bound, bound)
        b = jax.random.uniform(kb, (1, fan_out), jnp.float32, -bound, bound)
        return w, b

    w1, b1 = linear(ks[0], ks[1], input_size, hidden_size)
    w2, b2 = linear(ks[2], ks[3], hidden_size, hidden_size)
    w3, b3 = linear(ks[4], ks[5], hidden_size, num_classes)
    return (w1, b1, w2, b2, w3, b3)


def _reference_f32(x, params):
    w1, b1, w2, b2, w3, b3 = params
    h = jnp.maximum(x @ w1 + b1, 0.0)
    h = jnp.maximum(h @ w2 + b2, 0.0)
    return h @ w3 + b3


def _reference_bf16(x, params):
    """Same mixed precision as the kernel (bf16 matmul operands, f32 accumulate)."""
    w1, b1, w2, b2, w3, b3 = params
    bf = jnp.bfloat16
    h = jnp.dot(x.astype(bf), w1.astype(bf), preferred_element_type=jnp.float32) + b1
    h = jnp.maximum(h, 0.0)
    h = jnp.dot(h.astype(bf), w2.astype(bf), preferred_element_type=jnp.float32) + b2
    h = jnp.maximum(h, 0.0)
    return jnp.dot(h.astype(bf), w3.astype(bf), preferred_element_type=jnp.float32) + b3


if __name__ == "__main__":
    key = jax.random.PRNGKey(0)
    k_x, k_p, k_x2 = jax.random.split(key, 3)

    batch = 8
    input_size = 32
    hidden_size = 32
    num_classes = 8

    x = jax.random.normal(k_x, (batch, input_size), jnp.float32)
    params = init_params(k_p, input_size, hidden_size, num_classes)

    logits, bs = simple_classification_forward(x, params, batch)
    logits = jax.block_until_ready(logits)

    assert logits.shape == (batch, num_classes)
    assert bs == batch
    # Tight check vs a reference using the same bf16-MXU / f32-accumulate recipe.
    ref_bf16 = _reference_bf16(x, params)
    assert jnp.allclose(logits, ref_bf16, atol=1e-3, rtol=1e-3)
    # Looser check vs the pure-f32 PyTorch-equivalent forward.
    ref_f32 = _reference_f32(x, params)
    assert jnp.allclose(logits, ref_f32, atol=5e-2, rtol=5e-2)

    # Exercise the multi-step batch grid (TB=256, B_pad=512, grid=(2,)).
    x_big = jax.random.normal(k_x2, (300, input_size), jnp.float32)
    logits_big, bs_big = simple_classification_forward(x_big, params, 300)
    logits_big = jax.block_until_ready(logits_big)
    assert logits_big.shape == (300, num_classes)
    assert bs_big == 300
    assert jnp.allclose(logits_big, _reference_bf16(x_big, params), atol=1e-3, rtol=1e-3)

    print("KERNEL_OK")
</pallas_src>

<mosaic_0001>
module attributes {stable_mosaic.version = 11 : i64} {
  func.func @_mlp_kernel(%arg0: i32, %arg1: memref<8x128xbf16, #tpu.memory_space<vmem>>, %arg2: memref<128x128xbf16, #tpu.memory_space<vmem>>, %arg3: memref<128x128xbf16, #tpu.memory_space<vmem>>, %arg4: memref<128x128xbf16, #tpu.memory_space<vmem>>, %arg5: memref<3x128xf32, #tpu.memory_space<vmem>>, %arg6: memref<8x128xf32, #tpu.memory_space<vmem>>) attributes {dimension_semantics = [#tpu.dimension_semantics<parallel>], iteration_bounds = array<i64: 1>, scalar_prefetch = 0 : i64, scratch_operands = 0 : i64, tpu.core_type = #tpu.core_type<tc>, window_params = [{transform_indices = @transform_0, window_bounds = array<i64: 8, 128>}, {pipeline_mode = #tpu.pipeline_mode<synchronous>, transform_indices = @transform_1, window_bounds = array<i64: 128, 128>}, {pipeline_mode = #tpu.pipeline_mode<synchronous>, transform_indices = @transform_2, window_bounds = array<i64: 128, 128>}, {pipeline_mode = #tpu.pipeline_mode<synchronous>, transform_indices = @transform_3, window_bounds = array<i64: 128, 128>}, {pipeline_mode = #tpu.pipeline_mode<synchronous>, transform_indices = @transform_4, window_bounds = array<i64: 3, 128>}, {transform_indices = @transform_5, window_bounds = array<i64: 8, 128>}]} {
    %c0 = arith.constant 0 : index
    %c0_0 = arith.constant 0 : index
    %0 = vector.load %arg1[%c0, %c0_0] : memref<8x128xbf16, #tpu.memory_space<vmem>>, vector<8x128xbf16>
    %c0_1 = arith.constant 0 : index
    %c0_2 = arith.constant 0 : index
    %1 = vector.load %arg2[%c0_1, %c0_2] : memref<128x128xbf16, #tpu.memory_space<vmem>>, vector<128x128xbf16>
    %cst = arith.constant dense<0.000000e+00> : vector<8x128xf32>
    %2 = tpu.matmul %0, %1, %cst {dimension_numbers = #tpu.dot_dimension_numbers<[1], [0], [0], [1], [0, 0, 1, 1], [], []>} : vector<8x128xbf16>, vector<128x128xbf16>, vector<8x128xf32> -> vector<8x128xf32>
    %c0_3 = arith.constant 0 : index
    %c0_4 = arith.constant 0 : index
    %3 = vector.load %arg5[%c0_3, %c0_4] : memref<3x128xf32, #tpu.memory_space<vmem>>, vector<1x128xf32>
    %4 = vector.broadcast %3 : vector<1x128xf32> to vector<8x128xf32>
    %5 = arith.addf %2, %4 : vector<8x128xf32>
    %cst_5 = arith.constant 0.000000e+00 : f32
    %6 = vector.broadcast %cst_5 : f32 to vector<8x128xf32>
    %7 = arith.maximumf %5, %6 : vector<8x128xf32>
    %8 = arith.truncf %7 : vector<8x128xf32> to vector<8x128xbf16>
    %c0_6 = arith.constant 0 : index
    %c0_7 = arith.constant 0 : index
    %9 = vector.load %arg3[%c0_6, %c0_7] : memref<128x128xbf16, #tpu.memory_space<vmem>>, vector<128x128xbf16>
    %cst_8 = arith.constant dense<0.000000e+00> : vector<8x128xf32>
    %10 = tpu.matmul %8, %9, %cst_8 {dimension_numbers = #tpu.dot_dimension_numbers<[1], [0], [0], [1], [0, 0, 1, 1], [], []>} : vector<8x128xbf16>, vector<128x128xbf16>, vector<8x128xf32> -> vector<8x128xf32>
    %c1 = arith.constant 1 : index
    %c0_9 = arith.constant 0 : index
    %11 = vector.load %arg5[%c1, %c0_9] : memref<3x128xf32, #tpu.memory_space<vmem>>, vector<1x128xf32>
    %12 = vector.broadcast %11 : vector<1x128xf32> to vector<8x128xf32>
    %13 = arith.addf %10, %12 : vector<8x128xf32>
    %cst_10 = arith.constant 0.000000e+00 : f32
    %14 = vector.broadcast %cst_10 : f32 to vector<8x128xf32>
    %15 = arith.maximumf %13, %14 : vector<8x128xf32>
    %16 = arith.truncf %15 : vector<8x128xf32> to vector<8x128xbf16>
    %c0_11 = arith.constant 0 : index
    %c0_12 = arith.constant 0 : index
    %17 = vector.load %arg4[%c0_11, %c0_12] : memref<128x128xbf16, #tpu.memory_space<vmem>>, vector<128x128xbf16>
    %cst_13 = arith.constant dense<0.000000e+00> : vector<8x128xf32>
    %18 = tpu.matmul %16, %17, %cst_13 {dimension_numbers = #tpu.dot_dimension_numbers<[1], [0], [0], [1], [0, 0, 1, 1], [], []>} : vector<8x128xbf16>, vector<128x128xbf16>, vector<8x128xf32> -> vector<8x128xf32>
    %c2 = arith.constant 2 : index
    %c0_14 = arith.constant 0 : index
    %19 = vector.load %arg5[%c2, %c0_14] : memref<3x128xf32, #tpu.memory_space<vmem>>, vector<1x128xf32>
    %20 = vector.broadcast %19 : vector<1x128xf32> to vector<8x128xf32>
    %21 = arith.addf %18, %20 : vector<8x128xf32>
    %c0_15 = arith.constant 0 : index
    %c0_16 = arith.constant 0 : index
    %22 = vector.load %arg6[%c0_15, %c0_16] : memref<8x128xf32, #tpu.memory_space<vmem>>, vector<8x128xf32>
    tpu.vector_store %arg6[%c0_15, %c0_16], %21 {strides = array<i32>} : memref<8x128xf32, #tpu.memory_space<vmem>>, vector<8x128xf32>,
    return
  }
  func.func @transform_0(%arg0: i32) -> (i32, i32) {
    %c0_i32 = arith.constant 0 : i32
    %c0_i32_0 = arith.constant 0 : i32
    return %arg0, %c0_i32 : i32, i32
  }
  func.func @transform_1(%arg0: i32) -> (i32, i32) {
    %c0_i32 = arith.constant 0 : i32
    %c0_i32_0 = arith.constant 0 : i32
    %c0_i32_1 = arith.constant 0 : i32
    return %c0_i32, %c0_i32_0 : i32, i32
  }
  func.func @transform_2(%arg0: i32) -> (i32, i32) {
    %c0_i32 = arith.constant 0 : i32
    %c0_i32_0 = arith.constant 0 : i32
    %c0_i32_1 = arith.constant 0 : i32
    return %c0_i32, %c0_i32_0 : i32, i32
  }
  func.func @transform_3(%arg0: i32) -> (i32, i32) {
    %c0_i32 = arith.constant 0 : i32
    %c0_i32_0 = arith.constant 0 : i32
    %c0_i32_1 = arith.constant 0 : i32
    return %c0_i32, %c0_i32_0 : i32, i32
  }
  func.func @transform_4(%arg0: i32) -> (i32, i32) {
    %c0_i32 = arith.constant 0 : i32
    %c0_i32_0 = arith.constant 0 : i32
    %c0_i32_1 = arith.constant 0 : i32
    return %c0_i32, %c0_i32_0 : i32, i32
  }
  func.func @transform_5(%arg0: i32) -> (i32, i32) {
    %c0_i32 = arith.constant 0 : i32
    %c0_i32_0 = arith.constant 0 : i32
    return %arg0, %c0_i32 : i32, i32
  }
}

</mosaic_0001>

<bundles_post_ra>
// kernel: tpu_custom_call.1
= control target key start
LH: loop header
LB: loop body
LE: loop exit
PB: predicated region body
PF: predicated region fallthrough
CT: control target
= control target key end

     0   :  { %10 = vsyncpa [#allocation3], 0  ;;  %s696_s0 = inlined_call_operand.hbm [shape: bf16[8,128], index: 0, kind: input, shape index: {}]   ;;  %s697_s1 = inlined_call_operand.hbm [shape: bf16[128,128], index: 1, kind: input, shape index: {}]   ;;  %s698_s2 = inlined_call_operand.hbm [shape: bf16[128,128], index: 2, kind: input, shape index: {}]   ;;  %s699_s3 = inlined_call_operand.hbm [shape: bf16[128,128], index: 3, kind: input, shape index: {}]   ;;  %s700_s4 = inlined_call_operand.hbm [shape: f32[3,128], index: 4, kind: input, shape index: {}]   ;;  %s701_s5 = inlined_call_operand.hbm [shape: f32[8,128], index: 5, kind: output, shape index: {}]  }
   0x1   :  { %11 = vsyncpa [#allocation6], 0 }
   0x2   :  { %12 = vsyncpa [#allocation9], 0  ;;  %s29_s20 = sshll.u32 %s697_s1, 4  ;;  %s30_s20 = int_to_ptr.hbm [resolvable:$true] %s29_s20 }
   0x3   :  { %13 = vsyncpa [#allocation4], 0  ;;  %s640_s21 = smov [#allocation5]   ;;  %s55_s25 = sshll.u32 %s699_s3, 4  ;;  %s56_s25 = int_to_ptr.hbm [resolvable:$true] %s55_s25 }
   0x4   :  { %s31_s22 = sshll.u32 %s640_s21, 4  ;;  %s641_s26 = smov 64   ;;  %s32_s22 = int_to_ptr.vmem [resolvable:$true] %s31_s22 }
   0x5   :  { %s642_s27 = smov 4   ;;  %s643_s28 = smov [#allocation8]  }
   0x6   :  { %37 = dma.hbm_to_vmem [thread:$0]  %s30_s20, 1024, %s32_s22, [#allocation6], %s641_s26, %s641_s26, %s642_s27  }
   0x7   :  { %s57_s29 = sshll.u32 %s643_s28, 4  ;;  %s19_s7 = sshll.u32 %s696_s0, 4  ;;  %s58_s29 = int_to_ptr.vmem [resolvable:$true] %s57_s29  ;;  %s20_s7 = int_to_ptr.hbm [resolvable:$true] %s19_s7 }
   0x8   :  { %63 = dma.hbm_to_vmem [thread:$0]  %s56_s25, 1024, %s58_s29, [#allocation9], %s641_s26, %s641_s26, %s642_s27  }
   0x9   :  { %s42_s9 = sshll.u32 %s698_s2, 4  ;;  %s644_s10 = smov [#allocation2]   ;;  %s43_s9 = int_to_ptr.hbm [resolvable:$true] %s42_s9 }
   0xa   :  { %s21_s11 = sshll.u32 %s644_s10, 4  ;;  %s645_s3 = smov [#allocation7]   ;;  %s22_s11 = int_to_ptr.vmem [resolvable:$true] %s21_s11 }
   0xb   :  { %24 = dma.hbm_to_vmem [thread:$0]  %s20_s7, 64, %s22_s11, [#allocation3]  }
   0xc   :  { %s44_s12 = sshll.u32 %s645_s3, 4  ;;  %s69_s15 = sshll.u32 %s700_s4, 4  ;;  %s45_s12 = int_to_ptr.vmem [resolvable:$true] %s44_s12  ;;  %s70_s15 = int_to_ptr.hbm [resolvable:$true] %s69_s15 }
   0xd   :  { %50 = dma.hbm_to_vmem [thread:$0]  %s43_s9, 1024, %s45_s12, [#allocation6], %s641_s26, %s641_s26, %s642_s27  }
   0xe   :  { %s646_s0 = smov [#allocation10]  }
   0xf   :  { %s71_s16 = sshll.u32 %s646_s0, 4  ;;  %s72_s16 = int_to_ptr.vmem [resolvable:$true] %s71_s16 }
  0x10   :  { %74 = dma.hbm_to_vmem [thread:$0]  %s70_s15, 64, %s72_s16, [#allocation9]  }
  0x11   :  { %632 = dma.done.wait [#allocation3], 64  }
  0x12   :  { %633 = vsyncadd [#allocation3], 4294967232 }
  0x13   :  { %634 = dma.done.wait [#allocation6], 2048  }
  0x14   :  { %635 = vsyncadd [#allocation6], 4294965248 }
  0x15   :  { %636 = dma.done.wait [#allocation9], 1088  }
  0x16   :  { %637 = vsyncadd [#allocation9], 4294966208  ;;  %v460_v0 = vld [vmem:[#allocation5 + $0x38] sm:$0xff]  ;;  %v459_v1 = vld [vmem:[#allocation5 + $0x30] sm:$0xff]  ;;  %s647_s2 = smov [#allocation11]   ;;  %s345_s19 = sshll.u32 %s701_s5, 4  ;;  %s346_s19 = int_to_ptr.hbm [resolvable:$true] %s345_s19 }
  0x17   :  { %162 = vmatpush.bf16.msra.mxu0 %v460_v0  ;;  %v468_v2 = vld [vmem:[#allocation7 + $0x38] sm:$0xff]  ;;  %v467_v3 = vld [vmem:[#allocation7 + $0x30] sm:$0xff]  ;;  %v458_v4 = vld [vmem:[#allocation5 + $0x28] sm:$0xff]  ;;  %s343_s4 = sshll.u32 %s647_s2, 4  ;;  %s344_s4 = int_to_ptr.vmem [resolvable:$true] %s343_s4 }
  0x18   :  { %243 = vmatpush.bf16.msra.mxu1 %v468_v2  ;;  %v466_v5 = vld [vmem:[#allocation7 + $0x28] sm:$0xff]  ;;  %v457_v6 = vld [vmem:[#allocation5 + $0x20] sm:$0xff]  ;;  %v456_v8 = vld [vmem:[#allocation5 + $0x18] sm:$0xff] }
  0x19   :  { %v465_v7 = vld [vmem:[#allocation7 + $0x20] sm:$0xff]  ;;  %v464_v9 = vld [vmem:[#allocation7 + $0x18] sm:$0xff]  ;;  %v455_v10 = vld [vmem:[#allocation5 + $0x10] sm:$0xff] }
  0x1a   :  { %v463_v11 = vld [vmem:[#allocation7 + $0x10] sm:$0xff]  ;;  %v454_v12 = vld [vmem:[#allocation5 + $0x8] sm:$0xff]  ;;  %v453_v13 = vld [vmem:[#allocation5] sm:$0xff] }
  0x1b   :  { %163 = vmatpush.bf16.msra.mxu0 %v459_v1  ;;  %v95_v14 = vld [vmem:[#allocation2] sm:$0xf]  ;;  %v462_v15 = vld [vmem:[#allocation7 + $0x8] sm:$0xff]  ;;  %v461_v16 = vld [vmem:[#allocation7] sm:$0xff] }
  0x1c   :  { %244 = vmatpush.bf16.msra.mxu1 %v467_v3  ;;  %v476_v17 = vld [vmem:[#allocation8 + $0x38] sm:$0xff]  ;;  %v475_v18 = vld [vmem:[#allocation8 + $0x30] sm:$0xff]  ;;  %v474_v19 = vld [vmem:[#allocation8 + $0x28] sm:$0xff] }
  0x1d   :  { %324 = vmatpush.bf16.msra.mxu2 %v476_v17  ;;  %v473_v20 = vld [vmem:[#allocation8 + $0x20] sm:$0xff]  ;;  %v472_v21 = vld [vmem:[#allocation8 + $0x18] sm:$0xff]  ;;  %v471_v22 = vld [vmem:[#allocation8 + $0x10] sm:$0xff] }
  0x1e   :  { %v485_v23 = vld [vmem:[#allocation10] ss:$0 sm:$0xff]  ;;  %v470_v29 = vld [vmem:[#allocation8 + $0x8] sm:$0xff]  ;;  %v486_v31 = vld [vmem:[#allocation10 + $0x1] ss:$0 sm:$0xff] }
  0x1f   :  { %164 = vmatpush.bf16.msra.mxu0 %v458_v4  ;;  %v469_v30 = vld [vmem:[#allocation8] sm:$0xff] }
  0x20   :  { %245 = vmatpush.bf16.msra.mxu1 %v466_v5  ;;  %v487_v37 = vld [vmem:[#allocation10 + $0x2] ss:$0 sm:$0xff] }
  0x21   :  { %325 = vmatpush.bf16.msra.mxu2 %v475_v18 }
  0x23   :  { %165 = vmatpush.bf16.msra.mxu0 %v457_v6 }
  0x24   :  { %246 = vmatpush.bf16.msra.mxu1 %v465_v7 }
  0x25   :  { %326 = vmatpush.bf16.msra.mxu2 %v474_v19 }
  0x27   :  { %166 = vmatpush.bf16.msra.mxu0 %v456_v8 }
  0x28   :  { %247 = vmatpush.bf16.msra.mxu1 %v464_v9 }
  0x29   :  { %327 = vmatpush.bf16.msra.mxu2 %v473_v20 }
  0x2b   :  { %167 = vmatpush.bf16.msra.mxu0 %v455_v10 }
  0x2c   :  { %248 = vmatpush.bf16.msra.mxu1 %v463_v11 }
  0x2d   :  { %328 = vmatpush.bf16.msra.mxu2 %v472_v21 }
  0x2f   :  { %168 = vmatpush.bf16.msra.mxu0 %v454_v12 }
  0x30   :  { %249 = vmatpush.bf16.msra.mxu1 %v462_v15 }
  0x31   :  { %329 = vmatpush.bf16.msra.mxu2 %v471_v22 }
  0x33   :  { %169 = vmatpush.bf16.msra.mxu0 %v453_v13 }
  0x34   :  { %250 = vmatpush.bf16.msra.mxu1 %v461_v16 }
  0x35   :  { %330 = vmatpush.bf16.msra.mxu2 %v470_v29 }
  0x36   :  { %170 = vmatmul.bf16.vlgmr.msra.gmra.mxu0 %v95_v14 }
  0x39   :  { %331 = vmatpush.bf16.msra.mxu2 %v469_v30 }
  0xb3   :  { %v171_v24 = vpop.f32.mrf.mxu0 }
  0xb4   :  { %v172_v25 = vadd.f32 %v485_v23, %v171_v24 }
  0xb6   :  { %v175_v26 = vmax.f32 %v172_v25, 0.0 }
  0xb8   :  { %v176_v27 = vpack.c.bf16 %v175_v26, %v175_v26 }
  0xba   :  { %251 = vmatmul.bf16.vlgmr.msra.gmra.mxu1 %v176_v27 }
  0xbb   :  { %v173_v28 = vpop.f32.mrf.mxu0 }
 0x137   :  { %v252_v32 = vpop.f32.mrf.mxu1 }
 0x138   :  { %v253_v33 = vadd.f32 %v486_v31, %v252_v32 }
 0x13a   :  { %v256_v34 = vmax.f32 %v253_v33, 0.0 }
 0x13c   :  { %v257_v35 = vpack.c.bf16 %v256_v34, %v256_v34 }
 0x13e   :  { %332 = vmatmul.bf16.vlgmr.msra.gmra.mxu2 %v257_v35 }
 0x13f   :  { %v254_v36 = vpop.f32.mrf.mxu1 }
 0x1c1   :  { %v333_v38 = vpop.f32.mrf.mxu2 }
 0x1c2   :  { %v334_v39 = vadd.f32 %v487_v37, %v333_v38 }
 0x1c4   :  { %337 = vst [vmem:[#allocation11] sm:$0xff] %v334_v39 }
 0x1c5   :  { %348 = dma.vmem_to_hbm [thread:$0]  %s344_s4, 128, %s346_s19, [#allocation4]  }
 0x1c9   :  { %v335_v40 = vpop.f32.mrf.mxu2 }
 0x1ca   :  { %638 = dma.done.wait [#allocation4], 128  }
 0x1cb   :  { %639 = vsyncadd [#allocation4], 4294967168 }
 0x1cc   :  { %353 = vsyncpa [#allocation3], 1 }
 0x1cd   :  { %354 = vsyncpa [#allocation6], 1 }
 0x1ce   :  { %355 = vsyncpa [#allocation9], 1 }
 0x1cf   :  { %356 = vsyncpa [#allocation4], 1 }

</bundles_post_ra>
